<compile_context>
chip_gen: v7x
topology: tpu7x:2x2x1
jax: 0.10.0
libtpu: 0.0.40
codegen_flags: <defaults>
</compile_context>

<pallas_src>
import jax
import jax.numpy as jnp
from jax.experimental import pallas as pl
from jax.experimental.pallas import tpu as pltpu

H = 32   # hidden size fixed by nn.Linear(32, 1)
G = 4    # batches packed per lane-dense "super-row" (4 * H = 128 lanes)


def attention_kernel(x_ref, w4_ref, e4_ref, f4_ref, se_ref, b_ref, o_ref):
    """One grid step processes SRB super-rows (= 4*SRB batch rows).

    x_ref : (SRB, 4*T*H) VMEM  lane-dense x; super-row r packs batches 4r..4r+3
    w4_ref: (4*T*H, 4*T) VMEM  block-diagonal Linear weight (resident)
    e4_ref: (4*T, 4*T*H) VMEM  0/1 "repeat each score across its 32 lanes"
    f4_ref: (4*T*H, 128) VMEM  0/1 "sum over T, keep (batch-in-group, h)"
    se_ref: (4*T, 128)   VMEM  0/1 "softmax-denominator broadcast"
    b_ref : (1, 1)       SMEM  Linear bias
    o_ref : (SRB, 128)   VMEM  lane-dense output slab
    """
    x = x_ref[...]                                                     # (SRB, 4TH)
    # scores s[r, g*T+t] = <x[4r+g, t, :], w> + b   (MXU, block-diag weight)
    s = jnp.dot(x, w4_ref[...], preferred_element_type=jnp.float32) + b_ref[0, 0]
    # tanh(s) in (-1, 1)  =>  exp() is safe without max-subtraction
    e = jnp.exp(jnp.tanh(s))                                           # (SRB, 4T)
    # numerator: broadcast e over each 32-lane hidden slot, weight x, sum over T
    ebig = jnp.dot(e, e4_ref[...], preferred_element_type=jnp.float32)        # (SRB, 4TH)
    num = jnp.dot(ebig * x, f4_ref[...], preferred_element_type=jnp.float32)  # (SRB, 128)
    # denominator: sum_t e, broadcast over the 32 hidden lanes of each batch
    den = jnp.dot(e, se_ref[...], preferred_element_type=jnp.float32)         # (SRB, 128)
    r = pl.reciprocal(den, approx=True)   # EUP vrcp (free slot)
    r = r * (2.0 - den * r)               # one Newton step -> ~f32 exact
    o_ref[...] = (num * r).astype(o_ref.dtype)


def _build_constants(w, T, dtype):
    """Block-diagonal constants (resident in VMEM, fetched once)."""
    eye_gt = jnp.eye(G * T, dtype=dtype)
    w_col = w.reshape(H, 1).astype(dtype)
    w4 = jnp.kron(eye_gt, w_col)                                    # (4TH, 4T)
    e4 = jnp.kron(eye_gt, jnp.ones((1, H), dtype))                  # (4T, 4TH)
    f4 = jnp.kron(jnp.eye(G, dtype=dtype),
                  jnp.kron(jnp.ones((T, 1), dtype),
                           jnp.eye(H, dtype=dtype)))                # (4TH, 128)
    se = jnp.kron(jnp.eye(G, dtype=dtype), jnp.ones((T, H), dtype))  # (4T, 128)
    return w4, e4, f4, se


def _round_up(v, m):
    return ((v + m - 1) // m) * m


def _vmem_capacity_bytes():
    try:
        return int(pltpu.get_tpu_info().vmem_capacity_bytes)
    except Exception:
        return 64 << 20      # v7x per-TC VMEM; the most conservative generation


def _choose_block_b(B, T, vmem_cap):
    """Batch rows per grid step (multiple of 32 so all lane-dense blocks stay
    (8,128)-aligned).  Budget = double-buffered x block + ~2.5 block-sized f32
    temporaries (e@E4 and its product with x) + resident constants + margin."""
    row_bytes = T * H * 4                       # lane-dense: no 128-lane padding waste
    const_bytes = (2 * (G * T * H) * (G * T) + (G * T * H) * 128 + (G * T) * 128) * 4
    usable = int(vmem_cap * 0.7) - const_bytes - (4 << 20)
    bb = max(32, (usable // int(4.5 * row_bytes)) // 32 * 32)
    bb = min(bb, 4096)
    b32 = _round_up(B, 32)
    if b32 >= 128:            # >= 4 grid steps: megacore sharding + deeper pipeline
        bb = min(bb, _round_up(pl.cdiv(b32, 4), 32))
    elif b32 >= 64:           # >= 2 grid steps so both v7x TensorCores get work
        bb = min(bb, _round_up(pl.cdiv(b32, 2), 32))
    bb = min(bb, b32)
    return max(32, bb)


def attention_forward(x, w, b, *, block_b=None):
    """x: (B, T, 32) float32, w: (1, 32), b: (1, 1). Returns (B, 1, 32)."""
    B, T, h = x.shape
    assert h == H, f"hidden size must be {H}"
    # TODO(synk): for long sequences, tile T with an online-softmax accumulator
    # (running denominator + (BB,128) accumulator via pl.when); the constants
    # below grow as O(T^2) and are intended for small/moderate T only.

    vmem_cap = _vmem_capacity_bytes()
    if block_b is None:
        block_b = _choose_block_b(B, T, vmem_cap)
    block_b = max(32, _round_up(block_b, 32))

    B_pad = pl.cdiv(B, block_b) * block_b
    if B_pad != B:
        x = jnp.pad(x, ((0, B_pad - B), (0, 0), (0, 0)))   # zero rows -> zero outputs

    L = T * H
    x_sr = x.reshape(B_pad // G, G * L)          # free row-major collapse, lane-dense
    w4, e4, f4, se = _build_constants(w, T, x.dtype)

    srb = block_b // G
    grid = (B_pad // block_b,)

    out = pl.pallas_call(
        attention_kernel,
        out_shape=jax.ShapeDtypeStruct((B_pad // G, G * H), x.dtype),
        grid_spec=pltpu.PrefetchScalarGridSpec(
            num_scalar_prefetch=0,
            grid=grid,
            in_specs=[
                pl.BlockSpec((srb, G * L), lambda i: (i, 0)),       # x super-rows
                pl.BlockSpec((G * L, G * T), lambda i: (0, 0)),     # W4 (resident)
                pl.BlockSpec((G * T, G * L), lambda i: (0, 0)),     # E4 (resident)
                pl.BlockSpec((G * L, G * H), lambda i: (0, 0)),     # F4 (resident)
                pl.BlockSpec((G * T, G * H), lambda i: (0, 0)),     # SumExp (resident)
                pl.BlockSpec((1, 1), lambda i: (0, 0),
                             memory_space=pltpu.MemorySpace.SMEM),  # bias
            ],
            out_specs=pl.BlockSpec((srb, G * H), lambda i: (i, 0)),
        ),
        compiler_params=pltpu.CompilerParams(
            dimension_semantics=("parallel",),
            vmem_limit_bytes=int(vmem_cap * 0.75),
        ),
    )(x_sr, w4, e4, f4, se, b)

    # The (B_pad//4, 128) slab has the same row-major layout as (B_pad, 32).
    return out.reshape(B_pad, H)[:B].reshape(B, 1, H)


def reference_forward(x, w, b):
    """Pure-JAX reference mirroring the PyTorch forward (f32-exact matmuls)."""
    hp = jax.lax.Precision.HIGHEST
    att = jnp.tanh(jnp.einsum("bth,oh->bto", x, w, precision=hp) + b[0, 0])  # (B,T,1)
    att = jax.nn.softmax(att, axis=1)                                        # over T
    att = jnp.swapaxes(att, 1, 2)                                            # (B,1,T)
    return jnp.matmul(att, x, precision=hp)                                  # (B,1,H)


if __name__ == "__main__":
    key = jax.random.PRNGKey(0)
    kx, kw, kb = jax.random.split(key, 3)

    B, T = 2, 8
    x = jax.random.normal(kx, (B, T, H), dtype=jnp.float32)

    # Deterministic nn.Linear(32, 1)-style init: U(-1/sqrt(32), 1/sqrt(32))
    bound = 1.0 / (H ** 0.5)
    w = jax.random.uniform(kw, (1, H), jnp.float32, -bound, bound)
    b = jax.random.uniform(kb, (1, 1), jnp.float32, -bound, bound)

    out = attention_forward(x, w, b)
    out = jax.block_until_ready(out)

    ref = reference_forward(x, w, b)
    assert out.shape == (B, 1, H)
    assert jnp.allclose(out, ref, atol=1e-5, rtol=1e-5), "mismatch vs reference"

    print("KERNEL_OK")
</pallas_src>

<mosaic_0001>
module attributes {stable_mosaic.version = 11 : i64} {
  func.func @attention_kernel(%arg0: i32, %arg1: memref<8x1024xf32, #tpu.memory_space<vmem>>, %arg2: memref<1024x32xf32, #tpu.memory_space<vmem>>, %arg3: memref<32x1024xf32, #tpu.memory_space<vmem>>, %arg4: memref<1024x128xf32, #tpu.memory_space<vmem>>, %arg5: memref<32x128xf32, #tpu.memory_space<vmem>>, %arg6: memref<1x1xf32, #tpu.memory_space<smem>>, %arg7: memref<8x128xf32, #tpu.memory_space<vmem>>) attributes {dimension_semantics = [#tpu.dimension_semantics<parallel>], iteration_bounds = array<i64: 1>, scalar_prefetch = 0 : i64, scratch_operands = 0 : i64, tpu.core_type = #tpu.core_type<tc>, window_params = [{transform_indices = @transform_0, window_bounds = array<i64: 8, 1024>}, {pipeline_mode = #tpu.pipeline_mode<synchronous>, transform_indices = @transform_1, window_bounds = array<i64: 1024, 32>}, {pipeline_mode = #tpu.pipeline_mode<synchronous>, transform_indices = @transform_2, window_bounds = array<i64: 32, 1024>}, {pipeline_mode = #tpu.pipeline_mode<synchronous>, transform_indices = @transform_3, window_bounds = array<i64: 1024, 128>}, {pipeline_mode = #tpu.pipeline_mode<synchronous>, transform_indices = @transform_4, window_bounds = array<i64: 32, 128>}, {transform_indices = @transform_5, window_bounds = array<i64: 1, 1>}, {transform_indices = @transform_6, window_bounds = array<i64: 8, 128>}]} {
    %c0 = arith.constant 0 : index
    %c0_0 = arith.constant 0 : index
    %0 = vector.load %arg1[%c0, %c0_0] : memref<8x1024xf32, #tpu.memory_space<vmem>>, vector<8x1024xf32>
    %c0_1 = arith.constant 0 : index
    %c0_2 = arith.constant 0 : index
    %1 = vector.load %arg2[%c0_1, %c0_2] : memref<1024x32xf32, #tpu.memory_space<vmem>>, vector<1024x32xf32>
    %cst = arith.constant dense<0.000000e+00> : vector<8x32xf32>
    %2 = tpu.matmul %0, %1, %cst {dimension_numbers = #tpu.dot_dimension_numbers<[1], [0], [0], [1], [0, 0, 1, 1], [], []>} : vector<8x1024xf32>, vector<1024x32xf32>, vector<8x32xf32> -> vector<8x32xf32>
    %c0_3 = arith.constant 0 : index
    %c0_4 = arith.constant 0 : index
    %3 = memref.load %arg6[%c0_3, %c0_4] : memref<1x1xf32, #tpu.memory_space<smem>>
    %4 = vector.broadcast %3 : f32 to vector<8x32xf32>
    %5 = arith.addf %2, %4 : vector<8x32xf32>
    %6 = math.tanh %5 : vector<8x32xf32>
    %7 = math.exp %6 : vector<8x32xf32>
    %c0_5 = arith.constant 0 : index
    %c0_6 = arith.constant 0 : index
    %8 = vector.load %arg3[%c0_5, %c0_6] : memref<32x1024xf32, #tpu.memory_space<vmem>>, vector<32x1024xf32>
    %cst_7 = arith.constant dense<0.000000e+00> : vector<8x1024xf32>
    %9 = tpu.matmul %7, %8, %cst_7 {dimension_numbers = #tpu.dot_dimension_numbers<[1], [0], [0], [1], [0, 0, 1, 1], [], []>} : vector<8x32xf32>, vector<32x1024xf32>, vector<8x1024xf32> -> vector<8x1024xf32>
    %10 = arith.mulf %9, %0 : vector<8x1024xf32>
    %c0_8 = arith.constant 0 : index
    %c0_9 = arith.constant 0 : index
    %11 = vector.load %arg4[%c0_8, %c0_9] : memref<1024x128xf32, #tpu.memory_space<vmem>>, vector<1024x128xf32>
    %cst_10 = arith.constant dense<0.000000e+00> : vector<8x128xf32>
    %12 = tpu.matmul %10, %11, %cst_10 {dimension_numbers = #tpu.dot_dimension_numbers<[1], [0], [0], [1], [0, 0, 1, 1], [], []>} : vector<8x1024xf32>, vector<1024x128xf32>, vector<8x128xf32> -> vector<8x128xf32>
    %c0_11 = arith.constant 0 : index
    %c0_12 = arith.constant 0 : index
    %13 = vector.load %arg5[%c0_11, %c0_12] : memref<32x128xf32, #tpu.memory_space<vmem>>, vector<32x128xf32>
    %cst_13 = arith.constant dense<0.000000e+00> : vector<8x128xf32>
    %14 = tpu.matmul %7, %13, %cst_13 {dimension_numbers = #tpu.dot_dimension_numbers<[1], [0], [0], [1], [0, 0, 1, 1], [], []>} : vector<8x32xf32>, vector<32x128xf32>, vector<8x128xf32> -> vector<8x128xf32>
    %15 = tpu.reciprocal %14 {approx = true} : vector<8x128xf32> -> vector<8x128xf32>
    %16 = arith.mulf %14, %15 : vector<8x128xf32>
    %cst_14 = arith.constant 2.000000e+00 : f32
    %17 = vector.broadcast %cst_14 : f32 to vector<8x128xf32>
    %18 = arith.subf %17, %16 : vector<8x128xf32>
    %19 = arith.mulf %15, %18 : vector<8x128xf32>
    %20 = arith.mulf %12, %19 : vector<8x128xf32>
    %c0_15 = arith.constant 0 : index
    %c0_16 = arith.constant 0 : index
    %21 = vector.load %arg7[%c0_15, %c0_16] : memref<8x128xf32, #tpu.memory_space<vmem>>, vector<8x128xf32>
    tpu.vector_store %arg7[%c0_15, %c0_16], %20 {strides = array<i32>} : memref<8x128xf32, #tpu.memory_space<vmem>>, vector<8x128xf32>,
    return
  }
  func.func @transform_0(%arg0: i32) -> (i32, i32) {
    %c0_i32 = arith.constant 0 : i32
    %c0_i32_0 = arith.constant 0 : i32
    return %arg0, %c0_i32 : i32, i32
  }
  func.func @transform_1(%arg0: i32) -> (i32, i32) {
    %c0_i32 = arith.constant 0 : i32
    %c0_i32_0 = arith.constant 0 : i32
    %c0_i32_1 = arith.constant 0 : i32
    return %c0_i32, %c0_i32_0 : i32, i32
  }
  func.func @transform_2(%arg0: i32) -> (i32, i32) {
    %c0_i32 = arith.constant 0 : i32
    %c0_i32_0 = arith.constant 0 : i32
    %c0_i32_1 = arith.constant 0 : i32
    return %c0_i32, %c0_i32_0 : i32, i32
  }
  func.func @transform_3(%arg0: i32) -> (i32, i32) {
    %c0_i32 = arith.constant 0 : i32
    %c0_i32_0 = arith.constant 0 : i32
    %c0_i32_1 = arith.constant 0 : i32
    return %c0_i32, %c0_i32_0 : i32, i32
  }
  func.func @transform_4(%arg0: i32) -> (i32, i32) {
    %c0_i32 = arith.constant 0 : i32
    %c0_i32_0 = arith.constant 0 : i32
    %c0_i32_1 = arith.constant 0 : i32
    return %c0_i32, %c0_i32_0 : i32, i32
  }
  func.func @transform_5(%arg0: i32) -> (i32, i32) {
    %c0_i32 = arith.constant 0 : i32
    %c0_i32_0 = arith.constant 0 : i32
    %c0_i32_1 = arith.constant 0 : i32
    return %c0_i32, %c0_i32_0 : i32, i32
  }
  func.func @transform_6(%arg0: i32) -> (i32, i32) {
    %c0_i32 = arith.constant 0 : i32
    %c0_i32_0 = arith.constant 0 : i32
    return %arg0, %c0_i32 : i32, i32
  }
}

</mosaic_0001>

<bundles_post_ra>
// kernel: tpu_custom_call.1
= control target key start
LH: loop header
LB: loop body
LE: loop exit
PB: predicated region body
PF: predicated region fallthrough
CT: control target
= control target key end

     0   :  { %12 = vsyncpa [#allocation4], 0  ;;  %s2993_s0 = inlined_call_operand.hbm [shape: f32[8,1024], index: 0, kind: input, shape index: {}]   ;;  %s2994_s1 = inlined_call_operand.vmem [shape: f32[1024,32], index: 1, kind: input, shape index: {}]   ;;  %s2995_s2 = inlined_call_operand.vmem [shape: f32[32,1024], index: 2, kind: input, shape index: {}]   ;;  %s2996_s3 = inlined_call_operand.vmem [shape: f32[1024,128], index: 3, kind: input, shape index: {}]   ;;  %s2997_s4 = inlined_call_operand.hbm [shape: f32[32,128], index: 4, kind: input, shape index: {}]   ;;  %s2998_s5 = inlined_call_operand.<no memory space> [shape: f32[1,1], index: 5, kind: input, shape index: {}]   ;;  %s2999_s6 = inlined_call_operand.hbm [shape: f32[8,128], index: 6, kind: output, shape index: {}]  }
   0x1   :  { %13 = vsyncpa [#allocation7], 0 }
   0x2   :  { %14 = vsyncpa [#allocation5], 0  ;;  %s1985_s21 = smov [#allocation3]   ;;  %s1986_s23 = smov [#allocation6]  }
   0x3   :  { %s21_s22 = sshll.u32 %s1985_s21, 4  ;;  %s36_s24 = sshll.u32 %s1986_s23, 4  ;;  %s22_s22 = int_to_ptr.vmem [resolvable:$true] %s21_s22  ;;  %s2028_s24 = int_to_ptr.vmem [resolvable:$true] %s36_s24 }
   0x4   :  { %s1913_s27 = scalar_lea.hbm %s2993_s0, 1024 }
   0x5   :  { %p1914_p0 = scmp.ne.s32.totalorder %s2993_s0, %s1913_s27  ;;  %p1917_p1 = scmp.lt.u32.totalorder %s1913_s27, %s2993_s0 }
   0x7   :  { %p1919_p2 = pnand %p1917_p1, %p1914_p0 }
   0x9   :  { %1922 = shalt.err (!%p1919_p2)
}
   0xa   :  { %s1923_s8 = scalar_lea.vmem %s22_s22, 1024  ;;  %p1928_p4 = scmp.lt.s32.totalorder %s22_s22, %s22_s22 }
   0xb   :  { %p1924_p3 = scmp.ne.s32.totalorder %s22_s22, %s1923_s8  ;;  %p1929_p5 = scmp.lt.s32.totalorder %s1923_s8, %s1923_s8 }
   0xd   :  { %p1930_p6 = por %p1929_p5, %p1928_p4 }
   0xf   :  { %p1931_p7 = pnand %p1930_p6, %p1924_p3 }
  0x11   :  { %1934 = shalt.err (!%p1931_p7)
}
  0x12   :  { %24 = dma.hbm_to_vmem [thread:$0]  %s2993_s0, 1024, %s22_s22, [#allocation4]  }
  0x13   :  { %s1935_s13 = scalar_lea.hbm %s2997_s4, 512 }
  0x14   :  { %p1936_p8 = scmp.ne.s32.totalorder %s2997_s4, %s1935_s13  ;;  %p1939_p9 = scmp.lt.u32.totalorder %s1935_s13, %s2997_s4 }
  0x16   :  { %p1941_p10 = pnand %p1939_p9, %p1936_p8 }
  0x18   :  { %1944 = shalt.err (!%p1941_p10)
}
  0x19   :  { %s1945_s18 = scalar_lea.vmem %s2028_s24, 512  ;;  %p1950_p12 = scmp.lt.s32.totalorder %s2028_s24, %s2028_s24 }
  0x1a   :  { %p1946_p11 = scmp.ne.s32.totalorder %s2028_s24, %s1945_s18  ;;  %p1951_p13 = scmp.lt.s32.totalorder %s1945_s18, %s1945_s18 }
  0x1c   :  { %p1952_p0 = por %p1951_p13, %p1950_p12 }
  0x1e   :  { %p1953_p1 = pnand %p1952_p0, %p1946_p11 }
  0x20   :  { %1956 = shalt.err (!%p1953_p1)
}
  0x21   :  { %s1987_s0 = smov 128   ;;  %s1988_s19 = smov 8  }
  0x22   :  { %42 = dma.hbm_to_vmem [thread:$0]  %s2997_s4, 512, %s2028_s24, [#allocation7], %s1987_s0, %s1987_s0, %s1988_s19  }
  0x23   :  { %1979 = dma.done.wait [#allocation4], 1024  }
  0x24   :  { %1980 = vsyncadd [#allocation4], 4294966272 }
  0x25   :  { %1981 = dma.done.wait [#allocation7], 512  }
  0x26   :  { %1982 = vsyncadd [#allocation7], 4294966784  ;;  %v75_v0 = vld [vmem:[%s2994_s1 + $0x80] sm:$0xff]  ;;  %v76_v1 = vld [vmem:[%s2994_s1 + $0x88] sm:$0xff]  ;;  %vm504_vm0 = vcmask 261120   ;;  %vm1991_vm1 = vmmov 0  }
  0x27   :  { %v59_v2 = vld [vmem:[%s2994_s1] sm:$0xff]  ;;  %v1605_v3 = vpack.c.bf16 %v76_v1, %v75_v0  ;;  %v60_v4 = vld [vmem:[%s2994_s1 + $0x8] sm:$0xff]  ;;  %v77_v11 = vld [vmem:[%s2994_s1 + $0x90] sm:$0xff] }
  0x28   :  { %v107_v5 = vld [vmem:[%s2994_s1 + $0x180] sm:$0xff]  ;;  %v108_v6 = vld [vmem:[%s2994_s1 + $0x188] sm:$0xff]  ;;  %v1607_v7 = vpack.c.bf16 %v60_v4, %v59_v2  ;;  %v78_v13 = vld [vmem:[%s2994_s1 + $0x98] sm:$0xff] }
  0x29   :  { %v1637_v8 = vpack.c.bf16 %v108_v6, %v107_v5  ;;  %v91_v9 = vld [vmem:[%s2994_s1 + $0x100] sm:$0xff]  ;;  %v92_v10 = vld [vmem:[%s2994_s1 + $0x108] sm:$0xff]  ;;  %1606 = vmatprep.subr.bf16.mxu0 %v1605_v3  ;;  %v61_v14 = vld [vmem:[%s2994_s1 + $0x10] sm:$0xff]  ;;  %v1609_v16 = vpack.c.bf16 %v78_v13, %v77_v11 }
  0x2a   :  { %v1639_v12 = vpack.c.bf16 %v92_v10, %v91_v9  ;;  %v62_v15 = vld [vmem:[%s2994_s1 + $0x18] sm:$0xff]  ;;  %1608 = vmatpush3.bf16.msra.mxu0 %v1607_v7  ;;  %v109_v18 = vld [vmem:[%s2994_s1 + $0x190] sm:$0xff]  ;;  %v79_v23 = vld [vmem:[%s2994_s1 + $0xa0] sm:$0xff] }
  0x2b   :  { %1638 = vmatprep.subr.bf16.mxu1 %v1637_v8  ;;  %v1611_v17 = vpack.c.bf16 %v62_v15, %v61_v14  ;;  %v110_v19 = vld [vmem:[%s2994_s1 + $0x198] sm:$0xff]  ;;  %v93_v20 = vld [vmem:[%s2994_s1 + $0x110] sm:$0xff]  ;;  %v80_v24 = vld [vmem:[%s2994_s1 + $0xa8] sm:$0xff]  ;;  %1610 = vmatprep.subr.bf16.mxu0 %v1609_v16 }
  0x2c   :  { %1640 = vmatpush3.bf16.msra.mxu1 %v1639_v12  ;;  %v1641_v21 = vpack.c.bf16 %v110_v19, %v109_v18  ;;  %v94_v22 = vld [vmem:[%s2994_s1 + $0x118] sm:$0xff]  ;;  %v1613_v26 = vpack.c.bf16 %v80_v24, %v79_v23  ;;  %v63_v27 = vld [vmem:[%s2994_s1 + $0x20] sm:$0xff]  ;;  %v64_v28 = vld [vmem:[%s2994_s1 + $0x28] sm:$0xff] }
  0x2d   :  { %v1643_v25 = vpack.c.bf16 %v94_v22, %v93_v20  ;;  %v111_v29 = vld [vmem:[%s2994_s1 + $0x1a0] sm:$0xff]  ;;  %v112_v30 = vld [vmem:[%s2994_s1 + $0x1a8] sm:$0xff]  ;;  %v1615_v33 = vpack.c.bf16 %v64_v28, %v63_v27  ;;  %v81_v35 = vld [vmem:[%s2994_s1 + $0xb0] sm:$0xff] }
  0x2e   :  { %1642 = vmatprep.subr.bf16.mxu1 %v1641_v21  ;;  %v95_v31 = vld [vmem:[%s2994_s1 + $0x120] sm:$0xff]  ;;  %v96_v32 = vld [vmem:[%s2994_s1 + $0x128] sm:$0xff]  ;;  %1612 = vmatpush3.bf16.msra.mxu0 %v1611_v17  ;;  %v1645_v34 = vpack.c.bf16 %v112_v30, %v111_v29  ;;  %v82_v36 = vld [vmem:[%s2994_s1 + $0xb8] sm:$0xff] }
  0x2f   :  { %v65_v37 = vld [vmem:[%s2994_s1 + $0x30] sm:$0xff]  ;;  %1614 = vmatprep.subr.bf16.mxu0 %v1613_v26  ;;  %v1647_v38 = vpack.c.bf16 %v96_v32, %v95_v31  ;;  %v1617_v39 = vpack.c.bf16 %v82_v36, %v81_v35  ;;  %v66_v40 = vld [vmem:[%s2994_s1 + $0x38] sm:$0xff]  ;;  %v83_v46 = vld [vmem:[%s2994_s1 + $0xc0] sm:$0xff] }
  0x30   :  { %1644 = vmatpush3.bf16.msra.mxu1 %v1643_v25  ;;  %v113_v41 = vld [vmem:[%s2994_s1 + $0x1b0] sm:$0xff]  ;;  %v114_v42 = vld [vmem:[%s2994_s1 + $0x1b8] sm:$0xff]  ;;  %v84_v47 = vld [vmem:[%s2994_s1 + $0xc8] sm:$0xff]  ;;  %v1619_v48 = vpack.c.bf16 %v66_v40, %v65_v37 }
  0x31   :  { %1646 = vmatprep.subr.bf16.mxu1 %v1645_v34  ;;  %v1649_v43 = vpack.c.bf16 %v114_v42, %v113_v41  ;;  %v97_v44 = vld [vmem:[%s2994_s1 + $0x130] sm:$0xff]  ;;  %v98_v45 = vld [vmem:[%s2994_s1 + $0x138] sm:$0xff]  ;;  %v115_v49 = vld [vmem:[%s2994_s1 + $0x1c0] sm:$0xff]  ;;  %v1621_v52 = vpack.c.bf16 %v84_v47, %v83_v46 }
  0x32   :  { %1616 = vmatpush3.bf16.msra.mxu0 %v1615_v33  ;;  %v116_v50 = vld [vmem:[%s2994_s1 + $0x1c8] sm:$0xff]  ;;  %v1651_v51 = vpack.c.bf16 %v98_v45, %v97_v44  ;;  %v67_v53 = vld [vmem:[%s2994_s1 + $0x40] sm:$0xff]  ;;  %v85_v58 = vld [vmem:[%s2994_s1 + $0xd0] sm:$0xff] }
  0x33   :  { %1618 = vmatprep.subr.bf16.mxu0 %v1617_v39  ;;  %v68_v54 = vld [vmem:[%s2994_s1 + $0x48] sm:$0xff]  ;;  %v99_v55 = vld [vmem:[%s2994_s1 + $0x140] sm:$0xff]  ;;  %v1653_v56 = vpack.c.bf16 %v116_v50, %v115_v49  ;;  %v86_v59 = vld [vmem:[%s2994_s1 + $0xd8] sm:$0xff] }
  0x34   :  { %1648 = vmatpush3.bf16.msra.mxu1 %v1647_v38  ;;  %v100_v57 = vld [vmem:[%s2994_s1 + $0x148] sm:$0xff]  ;;  %v117_v60 = vld [vmem:[%s2994_s1 + $0x1d0] sm:$0xff]  ;;  %v118_v61 = vld [vmem:[%s2994_s1 + $0x1d8] sm:$0xff]  ;;  %v1623_v62 = vpack.c.bf16 %v68_v54, %v67_v53  ;;  %v1625_v0 = vpack.c.bf16 %v86_v59, %v85_v58 }
  0x35   :  { %1650 = vmatprep.subr.bf16.mxu1 %v1649_v43  ;;  %v1655_v63 = vpack.c.bf16 %v100_v57, %v99_v55  ;;  %v69_v1 = vld [vmem:[%s2994_s1 + $0x50] sm:$0xff]  ;;  %v70_v2 = vld [vmem:[%s2994_s1 + $0x58] sm:$0xff]  ;;  %v1657_v4 = vpack.c.bf16 %v118_v61, %v117_v60  ;;  %v87_v6 = vld [vmem:[%s2994_s1 + $0xe0] sm:$0xff] }
  0x36   :  { %1620 = vmatpush3.bf16.msra.mxu0 %v1619_v48  ;;  %v101_v3 = vld [vmem:[%s2994_s1 + $0x150] sm:$0xff]  ;;  %v102_v5 = vld [vmem:[%s2994_s1 + $0x158] sm:$0xff]  ;;  %v88_v7 = vld [vmem:[%s2994_s1 + $0xe8] sm:$0xff]  ;;  %v1627_v10 = vpack.c.bf16 %v70_v2, %v69_v1 }
  0x37   :  { %1622 = vmatprep.subr.bf16.mxu0 %v1621_v52  ;;  %v119_v8 = vld [vmem:[%s2994_s1 + $0x1e0] sm:$0xff]  ;;  %v120_v9 = vld [vmem:[%s2994_s1 + $0x1e8] sm:$0xff]  ;;  %v1659_v13 = vpack.c.bf16 %v102_v5, %v101_v3  ;;  %v1629_v14 = vpack.c.bf16 %v88_v7, %v87_v6  ;;  %v89_v19 = vld [vmem:[%s2994_s1 + $0xf0] sm:$0xff] }
  0x38   :  { %1652 = vmatpush3.bf16.msra.mxu1 %v1651_v51  ;;  %v71_v11 = vld [vmem:[%s2994_s1 + $0x60] sm:$0xff]  ;;  %v72_v12 = vld [vmem:[%s2994_s1 + $0x68] sm:$0xff]  ;;  %v1661_v18 = vpack.c.bf16 %v120_v9, %v119_v8  ;;  %v90_v20 = vld [vmem:[%s2994_s1 + $0xf8] sm:$0xff] }
  0x39   :  { %1654 = vmatprep.subr.bf16.mxu1 %v1653_v56  ;;  %v103_v15 = vld [vmem:[%s2994_s1 + $0x160] sm:$0xff]  ;;  %v104_v16 = vld [vmem:[%s2994_s1 + $0x168] sm:$0xff]  ;;  %v2236_v21 = vld [vmem:[#allocation3 + $0x18] sm:$0xff]  ;;  %v1631_v24 = vpack.c.bf16 %v72_v12, %v71_v11  ;;  %v1633_v26 = vpack.c.bf16 %v90_v20, %v89_v19 }
  0x3a   :  { %1624 = vmatpush3.bf16.msra.mxu0 %v1623_v62  ;;  %v2227_v17 = vld [vmem:[#allocation3 + $0x8] sm:$0xff]  ;;  %v121_v22 = vld [vmem:[%s2994_s1 + $0x1f0] sm:$0xff]  ;;  %v122_v23 = vld [vmem:[%s2994_s1 + $0x1f8] sm:$0xff]  ;;  %323 = vmatprep.mubr.f32.mxu1 %v2236_v21  ;;  %v1663_v25 = vpack.c.bf16 %v104_v16, %v103_v15 }
  0x3b   :  { %1626 = vmatprep.subr.bf16.mxu0 %v1625_v0  ;;  %253 = vmatprep.mubr.f32.mxu0 %v2227_v17  ;;  %v73_v27 = vld [vmem:[%s2994_s1 + $0x70] sm:$0xff]  ;;  %v74_v28 = vld [vmem:[%s2994_s1 + $0x78] sm:$0xff]  ;;  %v1665_v30 = vpack.c.bf16 %v122_v23, %v121_v22  ;;  %v139_v32 = vld [vmem:[%s2994_s1 + $0x280] sm:$0xff] }
  0x3c   :  { %1656 = vmatpush3.bf16.msra.mxu1 %v1655_v63  ;;  %v105_v29 = vld [vmem:[%s2994_s1 + $0x170] sm:$0xff]  ;;  %v106_v31 = vld [vmem:[%s2994_s1 + $0x178] sm:$0xff]  ;;  %v140_v33 = vld [vmem:[%s2994_s1 + $0x288] sm:$0xff]  ;;  %v1635_v36 = vpack.c.bf16 %v74_v28, %v73_v27 }
  0x3d   :  { %1658 = vmatprep.subr.bf16.mxu1 %v1657_v4  ;;  %v171_v34 = vld [vmem:[%s2994_s1 + $0x380] sm:$0xff]  ;;  %v172_v35 = vld [vmem:[%s2994_s1 + $0x388] sm:$0xff]  ;;  %v1667_v37 = vpack.c.bf16 %v106_v31, %v105_v29  ;;  %v1669_v38 = vpack.c.bf16 %v140_v33, %v139_v32  ;;  %v141_v44 = vld [vmem:[%s2994_s1 + $0x290] sm:$0xff] }
  0x3e   :  { %1628 = vmatpush3.bf16.msra.mxu0 %v1627_v10  ;;  %v123_v39 = vld [vmem:[%s2994_s1 + $0x200] sm:$0xff]  ;;  %v124_v40 = vld [vmem:[%s2994_s1 + $0x208] sm:$0xff]  ;;  %v1701_v42 = vpack.c.bf16 %v172_v35, %v171_v34  ;;  %v142_v45 = vld [vmem:[%s2994_s1 + $0x298] sm:$0xff] }
  0x3f   :  { %1630 = vmatprep.subr.bf16.mxu0 %v1629_v14  ;;  %v155_v41 = vld [vmem:[%s2994_s1 + $0x300] sm:$0xff]  ;;  %v156_v43 = vld [vmem:[%s2994_s1 + $0x308] sm:$0xff]  ;;  %v173_v46 = vld [vmem:[%s2994_s1 + $0x390] sm:$0xff]  ;;  %v1671_v49 = vpack.c.bf16 %v124_v40, %v123_v39  ;;  %v1673_v52 = vpack.c.bf16 %v142_v45, %v141_v44 }
  0x40   :  { %1660 = vmatpush3.bf16.msra.mxu1 %v1659_v13  ;;  %v174_v47 = vld [vmem:[%s2994_s1 + $0x398] sm:$0xff]  ;;  %v2293_v48 = vld [vmem:[#allocation3] sm:$0xff]  ;;  %v2295_v50 = vld [vmem:[#allocation3 + $0x10] sm:$0xff]  ;;  %v1703_v51 = vpack.c.bf16 %v156_v43, %v155_v41 }
  0x41   :  { %1662 = vmatprep.subr.bf16.mxu1 %v1661_v18  ;;  %v125_v53 = vld [vmem:[%s2994_s1 + $0x210] sm:$0xff]  ;;  %v126_v54 = vld [vmem:[%s2994_s1 + $0x218] sm:$0xff]  ;;  %v1705_v56 = vpack.c.bf16 %v174_v47, %v173_v46  ;;  %v143_v58 = vld [vmem:[%s2994_s1 + $0x2a0] sm:$0xff] }
  0x42   :  { %1632 = vmatpush3.bf16.msra.mxu0 %v1631_v24  ;;  %v157_v55 = vld [vmem:[%s2994_s1 + $0x310] sm:$0xff]  ;;  %v158_v57 = vld [vmem:[%s2994_s1 + $0x318] sm:$0xff]  ;;  %v144_v59 = vld [vmem:[%s2994_s1 + $0x2a8] sm:$0xff]  ;;  %v1675_v62 = vpack.c.bf16 %v126_v54, %v125_v53 }
  0x43   :  { %1634 = vmatprep.subr.bf16.mxu0 %v1633_v26  ;;  %v175_v60 = vld [vmem:[%s2994_s1 + $0x3a0] sm:$0xff]  ;;  %v176_v61 = vld [vmem:[%s2994_s1 + $0x3a8] sm:$0xff]  ;;  %v1707_v63 = vpack.c.bf16 %v158_v57, %v157_v55  ;;  %v1677_v0 = vpack.c.bf16 %v144_v59, %v143_v58  ;;  %v145_v6 = vld [vmem:[%s2994_s1 + $0x2b0] sm:$0xff] }
  0x44   :  { %1664 = vmatpush3.bf16.msra.mxu1 %v1663_v25  ;;  %v127_v1 = vld [vmem:[%s2994_s1 + $0x220] sm:$0xff]  ;;  %v128_v2 = vld [vmem:[%s2994_s1 + $0x228] sm:$0xff]  ;;  %v1709_v4 = vpack.c.bf16 %v176_v61, %v175_v60  ;;  %v146_v7 = vld [vmem:[%s2994_s1 + $0x2b8] sm:$0xff] }
  0x45   :  { %1666 = vmatprep.subr.bf16.mxu1 %v1665_v30  ;;  %v159_v3 = vld [vmem:[%s2994_s1 + $0x320] sm:$0xff]  ;;  %v160_v5 = vld [vmem:[%s2994_s1 + $0x328] sm:$0xff]  ;;  %v177_v8 = vld [vmem:[%s2994_s1 + $0x3b0] sm:$0xff]  ;;  %v1679_v10 = vpack.c.bf16 %v128_v2, %v127_v1  ;;  %v1681_v12 = vpack.c.bf16 %v146_v7, %v145_v6 }
  0x46   :  { %1636 = vmatpush3.bf16.msra.mxu0 %v1635_v36  ;;  %v178_v9 = vld [vmem:[%s2994_s1 + $0x3b8] sm:$0xff]  ;;  %v1711_v11 = vpack.c.bf16 %v160_v5, %v159_v3  ;;  %v129_v13 = vld [vmem:[%s2994_s1 + $0x230] sm:$0xff]  ;;  %v147_v19 = vld [vmem:[%s2994_s1 + $0x2c0] sm:$0xff] }
  0x47   :  { %1670 = vmatprep.subr.bf16.mxu0 %v1669_v38  ;;  %v130_v14 = vld [vmem:[%s2994_s1 + $0x238] sm:$0xff]  ;;  %v161_v15 = vld [vmem:[%s2994_s1 + $0x330] sm:$0xff]  ;;  %v1713_v16 = vpack.c.bf16 %v178_v9, %v177_v8  ;;  %v148_v20 = vld [vmem:[%s2994_s1 + $0x2c8] sm:$0xff] }
  0x48   :  { %1668 = vmatpush3.bf16.msra.mxu1 %v1667_v37  ;;  %v162_v18 = vld [vmem:[%s2994_s1 + $0x338] sm:$0xff]  ;;  %v179_v22 = vld [vmem:[%s2994_s1 + $0x3c0] sm:$0xff]  ;;  %v180_v23 = vld [vmem:[%s2994_s1 + $0x3c8] sm:$0xff]  ;;  %v1683_v24 = vpack.c.bf16 %v130_v14, %v129_v13  ;;  %v1685_v28 = vpack.c.bf16 %v148_v20, %v147_v19 }
  0x49   :  { %1702 = vmatprep.subr.bf16.mxu1 %v1701_v42  ;;  %254 = vmatmul.mubr.f32.vlgmr.msra.gmra.mrb[0].mxu0 %v2293_v48  ;;  %v2371_v25 = vld [vmem:[#allocation3 + $0x28] sm:$0xff]  ;;  %v2373_v26 = vld [vmem:[#allocation3 + $0x38] sm:$0xff]  ;;  %v1715_v27 = vpack.c.bf16 %v162_v18, %v161_v15  ;;  %v131_v29 = vld [vmem:[%s2994_s1 + $0x240] sm:$0xff]  ;;  %v1717_v32 = vpack.c.bf16 %v180_v23, %v179_v22 }
  0x4a   :  { %1672 = vmatpush3.bf16.msra.mxu0 %v1671_v49  ;;  %v132_v30 = vld [vmem:[%s2994_s1 + $0x248] sm:$0xff]  ;;  %v163_v31 = vld [vmem:[%s2994_s1 + $0x340] sm:$0xff]  ;;  %v149_v34 = vld [vmem:[%s2994_s1 + $0x2d0] sm:$0xff]  ;;  %393 = vmatprep.mubr.f32.mxu0 %v2371_v25 }
  0x4b   :  { %324 = vmatmul.mubr.f32.vlgmr.msra.gmra.mrb[0].mxu1 %v2295_v50  ;;  %1674 = vmatprep.subr.bf16.mxu0 %v1673_v52  ;;  %v164_v33 = vld [vmem:[%s2994_s1 + $0x348] sm:$0xff]  ;;  %v150_v35 = vld [vmem:[%s2994_s1 + $0x2d8] sm:$0xff]  ;;  %v181_v36 = vld [vmem:[%s2994_s1 + $0x3d0] sm:$0xff]  ;;  %v1687_v38 = vpack.c.bf16 %v132_v30, %v131_v29 }
  0x4c   :  { %1704 = vmatpush3.bf16.msra.mxu1 %v1703_v51  ;;  %v182_v37 = vld [vmem:[%s2994_s1 + $0x3d8] sm:$0xff]  ;;  %463 = vmatprep.mubr.f32.mxu1 %v2373_v26  ;;  %v1719_v39 = vpack.c.bf16 %v164_v33, %v163_v31  ;;  %v1689_v40 = vpack.c.bf16 %v150_v35, %v149_v34  ;;  %v133_v41 = vld [vmem:[%s2994_s1 + $0x250] sm:$0xff]  ;;  %v151_v46 = vld [vmem:[%s2994_s1 + $0x2e0] sm:$0xff] }
  0x4d   :  { %1706 = vmatprep.subr.bf16.mxu1 %v1705_v56  ;;  %v134_v42 = vld [vmem:[%s2994_s1 + $0x258] sm:$0xff]  ;;  %v165_v43 = vld [vmem:[%s2994_s1 + $0x350] sm:$0xff]  ;;  %v1721_v44 = vpack.c.bf16 %v182_v37, %v181_v36  ;;  %v152_v47 = vld [vmem:[%s2994_s1 + $0x2e8] sm:$0xff] }
  0x4e   :  { %1676 = vmatpush3.bf16.msra.mxu0 %v1675_v62  ;;  %v166_v45 = vld [vmem:[%s2994_s1 + $0x358] sm:$0xff]  ;;  %v183_v49 = vld [vmem:[%s2994_s1 + $0x3e0] sm:$0xff]  ;;  %v184_v51 = vld [vmem:[%s2994_s1 + $0x3e8] sm:$0xff]  ;;  %v1691_v52 = vpack.c.bf16 %v134_v42, %v133_v41  ;;  %v1693_v54 = vpack.c.bf16 %v152_v47, %v151_v46 }
  0x4f   :  { %1678 = vmatprep.subr.bf16.mxu0 %v1677_v0  ;;  %v1723_v53 = vpack.c.bf16 %v166_v45, %v165_v43  ;;  %v135_v55 = vld [vmem:[%s2994_s1 + $0x260] sm:$0xff]  ;;  %v136_v56 = vld [vmem:[%s2994_s1 + $0x268] sm:$0xff]  ;;  %v1725_v58 = vpack.c.bf16 %v184_v51, %v183_v49  ;;  %v153_v60 = vld [vmem:[%s2994_s1 + $0x2f0] sm:$0xff]  ;;  %v188_v49 = vstv %s2998_s5 }
  0x50   :  { %1708 = vmatpush3.bf16.msra.mxu1 %v1707_v63  ;;  %v167_v57 = vld [vmem:[%s2994_s1 + $0x360] sm:$0xff]  ;;  %v168_v59 = vld [vmem:[%s2994_s1 + $0x368] sm:$0xff]  ;;  %v154_v61 = vld [vmem:[%s2994_s1 + $0x2f8] sm:$0xff]  ;;  %v1695_v0 = vpack.c.bf16 %v136_v56, %v135_v55 }
  0x51   :  { %1710 = vmatprep.subr.bf16.mxu1 %v1709_v4  ;;  %v185_v62 = vld [vmem:[%s2994_s1 + $0x3f0] sm:$0xff]  ;;  %v186_v63 = vld [vmem:[%s2994_s1 + $0x3f8] sm:$0xff]  ;;  %v1727_v1 = vpack.c.bf16 %v168_v59, %v167_v57  ;;  %v1697_v2 = vpack.c.bf16 %v154_v61, %v153_v60  ;;  %v481_v13 = vld [vmem:[%s2995_s2 + $0x48] sm:$0xff] }
  0x52   :  { %1680 = vmatpush3.bf16.msra.mxu0 %v1679_v10  ;;  %v137_v3 = vld [vmem:[%s2994_s1 + $0x270] sm:$0xff]  ;;  %v138_v4 = vld [vmem:[%s2994_s1 + $0x278] sm:$0xff]  ;;  %v1729_v5 = vpack.c.bf16 %v186_v63, %v185_v62  ;;  %v2461_v10 = vld [vmem:[#allocation3 + $0x20] sm:$0xff] }
  0x53   :  { %1682 = vmatprep.subr.bf16.mxu0 %v1681_v12  ;;  %v169_v6 = vld [vmem:[%s2994_s1 + $0x370] sm:$0xff]  ;;  %v170_v7 = vld [vmem:[%s2994_s1 + $0x378] sm:$0xff]  ;;  %v1699_v8 = vpack.c.bf16 %v138_v4, %v137_v3  ;;  %v473_v12 = vld [vmem:[%s2995_s2 + $0x8] sm:$0xff] }
  0x54   :  { %1712 = vmatpush3.bf16.msra.mxu1 %v1711_v11  ;;  %v1731_v9 = vpack.c.bf16 %v170_v7, %v169_v6  ;;  %v2463_v11 = vld [vmem:[#allocation3 + $0x30] sm:$0xff]  ;;  %v475_v14 = vld [vmem:[%s2995_s2 + $0x18] sm:$0xff]  ;;  %v1733_v15 = vpack.c.bf16 %v481_v13, %v473_v12  ;;  %v472_v18 = vld [vmem:[%s2995_s2] sm:$0xff] }
  0x55   :  { %1714 = vmatprep.subr.bf16.mxu1 %v1713_v16  ;;  %v483_v16 = vld [vmem:[%s2995_s2 + $0x58] sm:$0xff]  ;;  %v480_v19 = vld [vmem:[%s2995_s2 + $0x40] sm:$0xff]  ;;  %v474_v23 = vld [vmem:[%s2995_s2 + $0x10] sm:$0xff] }
  0x56   :  { %1684 = vmatpush3.bf16.msra.mxu0 %v1683_v24  ;;  %v1741_v20 = vpack.c.bf16 %v483_v16, %v475_v14  ;;  %v1735_v22 = vpack.c.bf16 %v480_v19, %v472_v18  ;;  %v482_v24 = vld [vmem:[%s2995_s2 + $0x50] sm:$0xff]  ;;  %v497_v30 = vld [vmem:[%s2995_s2 + $0xc8] sm:$0xff]  ;;  %v491_v31 = vld [vmem:[%s2995_s2 + $0x98] sm:$0xff] }
  0x57   :  { %1686 = vmatprep.subr.bf16.mxu0 %v1685_v28  ;;  %v1989_v28 = vmov 0.0   ;;  %v1743_v29 = vpack.c.bf16 %v482_v24, %v474_v23  ;;  %v488_v35 = vld [vmem:[%s2995_s2 + $0x80] sm:$0xff]  ;;  %v490_v37 = vld [vmem:[%s2995_s2 + $0x90] sm:$0xff]  ;;  %v485_v41 = vld [vmem:[%s2995_s2 + $0x68] sm:$0xff] }
  0x58   :  { %1716 = vmatpush3.bf16.msra.mxu1 %v1715_v27  ;;  %v489_v27 = vld [vmem:[%s2995_s2 + $0x88] sm:$0xff]  ;;  %v496_v36 = vld [vmem:[%s2995_s2 + $0xc0] sm:$0xff]  ;;  %v487_v45 = vld [vmem:[%s2995_s2 + $0x78] sm:$0xff] }
  0x59   :  { %1718 = vmatprep.subr.bf16.mxu1 %v1717_v32  ;;  %v499_v32 = vld [vmem:[%s2995_s2 + $0xd8] sm:$0xff]  ;;  %v1737_v33 = vpack.c.bf16 %v497_v30, %v489_v27  ;;  %v476_v4 = vld [vmem:[%s2995_s2 + $0x20] sm:$0xff]  ;;  %v478_v6 = vld [vmem:[%s2995_s2 + $0x30] sm:$0xff] }
  0x5a   :  { %1688 = vmatpush3.bf16.msra.mxu0 %v1687_v38  ;;  %v1745_v34 = vpack.c.bf16 %v499_v32, %v491_v31  ;;  %v1739_v38 = vpack.c.bf16 %v496_v36, %v488_v35  ;;  %v486_v7 = vld [vmem:[%s2995_s2 + $0x70] sm:$0xff]  ;;  %v495_v12 = vld [vmem:[%s2995_s2 + $0xb8] sm:$0xff]  ;;  %v492_v16 = vld [vmem:[%s2995_s2 + $0xa0] sm:$0xff] }
  0x5b   :  { %1690 = vmatprep.subr.bf16.mxu0 %v1689_v40  ;;  %v477_v40 = vld [vmem:[%s2995_s2 + $0x28] sm:$0xff]  ;;  %v503_v13 = vld [vmem:[%s2995_s2 + $0xf8] sm:$0xff]  ;;  %v500_v18 = vld [vmem:[%s2995_s2 + $0xe0] sm:$0xff] }
  0x5c   :  { %1720 = vmatpush3.bf16.msra.mxu1 %v1719_v39  ;;  %v498_v39 = vld [vmem:[%s2995_s2 + $0xd0] sm:$0xff]  ;;  %v1749_v43 = vpack.c.bf16 %v485_v41, %v477_v40  ;;  %v816_v24 = vld [vmem:[%s2996_s3 + $0x80] sm:$0xff]  ;;  %v849_v31 = vld [vmem:[%s2996_s3 + $0x188] sm:$0xff]  ;;  %v1755_v32 = vpack.c.bf16 %v500_v18, %v492_v16 }
  0x5d   :  { %1722 = vmatprep.subr.bf16.mxu1 %v1721_v44  ;;  %v1747_v42 = vpack.c.bf16 %v498_v39, %v490_v37  ;;  %v479_v44 = vld [vmem:[%s2995_s2 + $0x38] sm:$0xff]  ;;  %v502_v23 = vld [vmem:[%s2995_s2 + $0xf0] sm:$0xff]  ;;  %v848_v30 = vld [vmem:[%s2996_s3 + $0x180] sm:$0xff] }
  0x5e   :  { %1692 = vmatpush3.bf16.msra.mxu0 %v1691_v52  ;;  %v1757_v46 = vpack.c.bf16 %v487_v45, %v479_v44  ;;  %v801_v35 = vld [vmem:[%s2996_s3 + $0x8] sm:$0xff]  ;;  %v1797_v37 = vpack.c.bf16 %v849_v31, %v848_v30  ;;  %v818_v40 = vld [vmem:[%s2996_s3 + $0x90] sm:$0xff]  ;;  %v819_v41 = vld [vmem:[%s2996_s3 + $0x98] sm:$0xff] }
  0x5f   :  { %1694 = vmatprep.subr.bf16.mxu0 %v1693_v54  ;;  %v833_v39 = vld [vmem:[%s2996_s3 + $0x108] sm:$0xff]  ;;  %v824_v16 = vld [vmem:[%s2996_s3 + $0xc0] sm:$0xff] }
  0x60   :  { %1724 = vmatpush3.bf16.msra.mxu1 %v1723_v53  ;;  %v825_v18 = vld [vmem:[%s2996_s3 + $0xc8] sm:$0xff] }
  0x61   :  { %1726 = vmatprep.subr.bf16.mxu1 %v1725_v58  ;;  %v1781_v30 = vpack.c.bf16 %v825_v18, %v824_v16  ;;  %v913_v16 = vld [vmem:[%s2996_s3 + $0x388] sm:$0xff] }
  0x62   :  { %1696 = vmatpush3.bf16.msra.mxu0 %v1695_v0 }
  0x63   :  { %1698 = vmatprep.subr.bf16.mxu0 %v1697_v2 }
  0x64   :  { %1728 = vmatpush3.bf16.msra.mxu1 %v1727_v1 }
  0x65   :  { %1730 = vmatprep.subr.bf16.mxu1 %v1729_v5  ;;  %v484_v5 = vld [vmem:[%s2995_s2 + $0x60] sm:$0xff] }
  0x66   :  { %1700 = vmatpush3.bf16.msra.mxu0 %v1699_v8  ;;  %v493_v8 = vld [vmem:[%s2995_s2 + $0xa8] sm:$0xff]  ;;  %v1751_v14 = vpack.c.bf16 %v484_v5, %v476_v4  ;;  %v854_v4 = vld [vmem:[%s2996_s3 + $0x1b0] sm:$0xff]  ;;  %v855_v5 = vld [vmem:[%s2996_s3 + $0x1b8] sm:$0xff] }
  0x67   :  { %1734 = vmatprep.subr.bf16.mxu0 %v1733_v15  ;;  %v1759_v15 = vpack.c.bf16 %v486_v7, %v478_v6 }
  0x68   :  { %1732 = vmatpush3.bf16.msra.mxu1 %v1731_v9  ;;  %v501_v9 = vld [vmem:[%s2995_s2 + $0xe8] sm:$0xff] }
  0x69   :  { %394 = vmatmul.mubr.f32.vlgmr.msra.gmra.mrb[2].mxu0 %v2461_v10  ;;  %1742 = vmatprep.subr.bf16.mxu1 %v1741_v20  ;;  %v1753_v19 = vpack.c.bf16 %v501_v9, %v493_v8  ;;  %v1761_v20 = vpack.c.bf16 %v503_v13, %v495_v12  ;;  %v806_v8 = vld [vmem:[%s2996_s3 + $0x30] sm:$0xff]  ;;  %v807_v9 = vld [vmem:[%s2996_s3 + $0x38] sm:$0xff]  ;;  %v1809_v13 = vpack.c.bf16 %v855_v5, %v854_v4 }
  0x6a   :  { %572 = vmatprep.mubr.f32.mxu0 %v1989_v28  ;;  %1736 = vmatpush1.bf16.msra.mxu0 %v1735_v22  ;;  %v494_v22 = vld [vmem:[%s2995_s2 + $0xb0] sm:$0xff]  ;;  %v815_v4 = vld [vmem:[%s2996_s3 + $0x78] sm:$0xff] }
  0x6b   :  { %464 = vmatmul.mubr.f32.vlgmr.msra.gmra.mrb[2].mxu1 %v2463_v11  ;;  %1738 = vmatprep.subr.bf16.mxu0 %v1737_v33  ;;  %v1763_v33 = vpack.c.bf16 %v502_v23, %v494_v22  ;;  %v1779_v22 = vpack.c.bf16 %v807_v9, %v806_v8  ;;  %v847_v8 = vld [vmem:[%s2996_s3 + $0x178] sm:$0xff] }
  0x6c   :  { %643 = vmatprep.mubr.f32.mxu1 %v1989_v28  ;;  %1744 = vmatpush1.bf16.msra.mxu1 %v1743_v29  ;;  %v817_v29 = vld [vmem:[%s2996_s3 + $0x88] sm:$0xff] }
  0x6d   :  { %1746 = vmatprep.subr.bf16.mxu1 %v1745_v34  ;;  %v800_v34 = vld [vmem:[%s2996_s3] sm:$0xff]  ;;  %v1765_v36 = vpack.c.bf16 %v817_v29, %v816_v24  ;;  %v809_v29 = vld [vmem:[%s2996_s3 + $0x48] sm:$0xff] }
  0x6e   :  { %1740 = vmatpush1.bf16.msra.mxu0 %v1739_v38  ;;  %v832_v38 = vld [vmem:[%s2996_s3 + $0x100] sm:$0xff]  ;;  %v1767_v44 = vpack.c.bf16 %v801_v35, %v800_v34  ;;  %v826_v34 = vld [vmem:[%s2996_s3 + $0xd0] sm:$0xff]  ;;  %v827_v35 = vld [vmem:[%s2996_s3 + $0xd8] sm:$0xff] }
  0x6f   :  { %1750 = vmatprep.subr.bf16.mxu0 %v1749_v43  ;;  %v851_v43 = vld [vmem:[%s2996_s3 + $0x198] sm:$0xff]  ;;  %v1799_v45 = vpack.c.bf16 %v833_v39, %v832_v38  ;;  %v808_v24 = vld [vmem:[%s2996_s3 + $0x40] sm:$0xff] }
  0x70   :  { %1748 = vmatpush1.bf16.msra.mxu1 %v1747_v42  ;;  %v850_v42 = vld [vmem:[%s2996_s3 + $0x190] sm:$0xff]  ;;  %v1783_v38 = vpack.c.bf16 %v809_v29, %v808_v24 }
  0x71   :  { %1758 = vmatprep.subr.bf16.mxu1 %v1757_v46  ;;  %v802_v46 = vld [vmem:[%s2996_s3 + $0x10] sm:$0xff] }
  0x72   :  { %v882_v24 = vld [vmem:[%s2996_s3 + $0x290] sm:$0xff] }
 0x11c   :  { %v1341_v47 = vpop.f32.mrb[0].mxu0 }
 0x11d   :  { %v1342_v51 = vpop.f32.mrb[1].mxu0 }
 0x11e   :  { %v1376_v52 = vpop.f32.mrb[0].mxu1  ;;  %v1343_v53 = vadd.f32 %v1342_v51, %v1341_v47  ;;  %v803_v47 = vld [vmem:[%s2996_s3 + $0x18] sm:$0xff]  ;;  %v1801_v51 = vpack.c.bf16 %v851_v43, %v850_v42  ;;  %v1785_v42 = vpack.c.bf16 %v827_v35, %v826_v34 }
 0x11f   :  { %v1377_v54 = vpop.f32.mrb[1].mxu1 }
 0x120   :  { %v1378_v55 = vadd.f32 %v1377_v54, %v1376_v52  ;;  %v256_v56 = vadd.f32 %v1343_v53, %v188_v49  ;;  %v1769_v49 = vpack.c.bf16 %v819_v41, %v818_v40  ;;  %v834_v52 = vld [vmem:[%s2996_s3 + $0x110] sm:$0xff]  ;;  %v835_v53 = vld [vmem:[%s2996_s3 + $0x118] sm:$0xff]  ;;  %v820_v54 = vld [vmem:[%s2996_s3 + $0xa0] sm:$0xff] }
 0x121   :  { %v810_v40 = vld [vmem:[%s2996_s3 + $0x50] sm:$0xff]  ;;  %v811_v41 = vld [vmem:[%s2996_s3 + $0x58] sm:$0xff] }
 0x122   :  { %v326_v57 = vadd.f32 %v1378_v55, %v256_v56  ;;  %v821_v55 = vld [vmem:[%s2996_s3 + $0xa8] sm:$0xff]  ;;  %v852_v56 = vld [vmem:[%s2996_s3 + $0x1a0] sm:$0xff] }
 0x13c   :  { %v1411_v58 = vpop.f32.mrb[2].mxu0 }
 0x13d   :  { %v1412_v59 = vpop.f32.mrb[3].mxu0 }
 0x13e   :  { %v1446_v60 = vpop.f32.mrb[2].mxu1  ;;  %v1413_v61 = vadd.f32 %v1412_v59, %v1411_v58  ;;  %v1771_v58 = vpack.c.bf16 %v803_v47, %v802_v46  ;;  %v1803_v59 = vpack.c.bf16 %v835_v53, %v834_v52  ;;  %v828_v46 = vld [vmem:[%s2996_s3 + $0xe0] sm:$0xff]  ;;  %v829_v47 = vld [vmem:[%s2996_s3 + $0xe8] sm:$0xff]  ;;  %v1787_v52 = vpack.c.bf16 %v811_v41, %v810_v40  ;;  %v866_v40 = vld [vmem:[%s2996_s3 + $0x210] sm:$0xff] }
 0x13f   :  { %v1447_v62 = vpop.f32.mrb[3].mxu1  ;;  %v867_v41 = vld [vmem:[%s2996_s3 + $0x218] sm:$0xff] }
 0x140   :  { %v1448_v63 = vadd.f32 %v1447_v62, %v1446_v60  ;;  %v396_v0 = vadd.f32 %v1413_v61, %v326_v57  ;;  %v853_v57 = vld [vmem:[%s2996_s3 + $0x1a8] sm:$0xff]  ;;  %v804_v60 = vld [vmem:[%s2996_s3 + $0x20] sm:$0xff]  ;;  %v1773_v62 = vpack.c.bf16 %v821_v55, %v820_v54  ;;  %v1789_v55 = vpack.c.bf16 %v829_v47, %v828_v46 }
 0x141   :  { %v805_v61 = vld [vmem:[%s2996_s3 + $0x28] sm:$0xff]  ;;  %v812_v54 = vld [vmem:[%s2996_s3 + $0x60] sm:$0xff] }
 0x142   :  { %v466_v1 = vadd.f32 %v1448_v63, %v396_v0  ;;  %v1805_v63 = vpack.c.bf16 %v853_v57, %v852_v56  ;;  %v836_v0 = vld [vmem:[%s2996_s3 + $0x120] sm:$0xff]  ;;  %v1775_v6 = vpack.c.bf16 %v805_v61, %v804_v60  ;;  %v813_v57 = vld [vmem:[%s2996_s3 + $0x68] sm:$0xff] }
 0x143   :  { %v1791_v60 = vpack.c.bf16 %v813_v57, %v812_v54  ;;  %v884_v46 = vld [vmem:[%s2996_s3 + $0x2a0] sm:$0xff]  ;;  %v917_v47 = vld [vmem:[%s2996_s3 + $0x3a8] sm:$0xff] }
 0x144   :  { %1907 = vtanh.f32 %v466_v1  ;;  %v837_v1 = vld [vmem:[%s2996_s3 + $0x128] sm:$0xff] }
 0x145   :  { %v1807_v7 = vpack.c.bf16 %v837_v1, %v836_v0  ;;  %v862_v0 = vld [vmem:[%s2996_s3 + $0x1f0] sm:$0xff]  ;;  %v901_v57 = vld [vmem:[%s2996_s3 + $0x328] sm:$0xff] }
 0x14e   :  { %v1908_v2 = vpop.eup %1907 }
 0x14f   :  { %v470_v3 = vmul.f32 1.442695, %v1908_v2  ;;  %v822_v2 = vld [vmem:[%s2996_s3 + $0xb0] sm:$0xff] }
 0x151   :  { %1909 = vpow2.f32 %v470_v3  ;;  %v823_v3 = vld [vmem:[%s2996_s3 + $0xb8] sm:$0xff] }
 0x152   :  { %v1777_v12 = vpack.c.bf16 %v823_v3, %v822_v2  ;;  %v863_v2 = vld [vmem:[%s2996_s3 + $0x1f8] sm:$0xff]  ;;  %v814_v3 = vld [vmem:[%s2996_s3 + $0x70] sm:$0xff] }
 0x153   :  { %v1825_v5 = vpack.c.bf16 %v863_v2, %v862_v0 }
 0x15b   :  { %v2571_v27 = vpop.eup %1909 }
 0x15c   :  { %1304 = vmatmul.mubr.msk.f32.vlgmr.msra.gmra.mrb[4].mxu0 %vm504_vm0, %v2571_v27  ;;  %1305 = vmatmul.mubr.msk.f32.vlgmr.msra.gmra.mrb[4].mxu1 %vm504_vm0, %v2571_v27 }
 0x15d   :  { %1752 = vmatpush1.bf16.msra.mxu0 %v1751_v14  ;;  %1760 = vmatpush1.bf16.msra.mxu1 %v1759_v15  ;;  %v838_v14 = vld [vmem:[%s2996_s3 + $0x130] sm:$0xff]  ;;  %v839_v15 = vld [vmem:[%s2996_s3 + $0x138] sm:$0xff] }
 0x15e   :  { %1754 = vmatprep.subr.bf16.mxu0 %v1753_v19  ;;  %1762 = vmatprep.subr.bf16.mxu1 %v1761_v20  ;;  %v856_v19 = vld [vmem:[%s2996_s3 + $0x1c0] sm:$0xff]  ;;  %v857_v20 = vld [vmem:[%s2996_s3 + $0x1c8] sm:$0xff]  ;;  %v1811_v23 = vpack.c.bf16 %v839_v15, %v838_v14 }
 0x15f   :  { %714 = vmatprep.mubr.f32.mxu0 %v1989_v28  ;;  %785 = vmatprep.mubr.f32.mxu1 %v1989_v28  ;;  %v1813_v31 = vpack.c.bf16 %v857_v20, %v856_v19  ;;  %v912_v14 = vld [vmem:[%s2996_s3 + $0x380] sm:$0xff]  ;;  %v865_v20 = vld [vmem:[%s2996_s3 + $0x208] sm:$0xff] }
 0x160   :  { %v1861_v18 = vpack.c.bf16 %v913_v16, %v912_v14  ;;  %v864_v19 = vld [vmem:[%s2996_s3 + $0x200] sm:$0xff] }
 0x161   :  { %1756 = vmatpush1.bf16.msra.mxu0 %v1755_v32  ;;  %1764 = vmatpush1.bf16.msra.mxu1 %v1763_v33  ;;  %v840_v32 = vld [vmem:[%s2996_s3 + $0x140] sm:$0xff]  ;;  %v841_v33 = vld [vmem:[%s2996_s3 + $0x148] sm:$0xff] }
 0x162   :  { %1766 = vmatprep.subr.bf16.mxu0 %v1765_v36  ;;  %1798 = vmatprep.subr.bf16.mxu1 %v1797_v37  ;;  %v858_v36 = vld [vmem:[%s2996_s3 + $0x1d0] sm:$0xff]  ;;  %v859_v37 = vld [vmem:[%s2996_s3 + $0x1d8] sm:$0xff]  ;;  %v1815_v39 = vpack.c.bf16 %v841_v33, %v840_v32  ;;  %v920_v14 = vld [vmem:[%s2996_s3 + $0x3c0] sm:$0xff] }
 0x163   :  { %v1817_v43 = vpack.c.bf16 %v859_v37, %v858_v36  ;;  %v914_v32 = vld [vmem:[%s2996_s3 + $0x390] sm:$0xff]  ;;  %v915_v33 = vld [vmem:[%s2996_s3 + $0x398] sm:$0xff] }
 0x164   :  { %1306 = vmatmul.mubr.msk.f32.vlgmr.msra.gmra.mrb[6].mxu0 %vm504_vm0, %v2571_v27  ;;  %1307 = vmatmul.mubr.msk.f32.vlgmr.msra.gmra.mrb[6].mxu1 %vm504_vm0, %v2571_v27 }
 0x165   :  { %1768 = vmatpush3.bf16.msra.mxu0 %v1767_v44  ;;  %1800 = vmatpush3.bf16.msra.mxu1 %v1799_v45  ;;  %v842_v44 = vld [vmem:[%s2996_s3 + $0x150] sm:$0xff]  ;;  %v843_v45 = vld [vmem:[%s2996_s3 + $0x158] sm:$0xff] }
 0x166   :  { %1770 = vmatprep.subr.bf16.mxu0 %v1769_v49  ;;  %1802 = vmatprep.subr.bf16.mxu1 %v1801_v51  ;;  %v860_v49 = vld [vmem:[%s2996_s3 + $0x1e0] sm:$0xff]  ;;  %v861_v51 = vld [vmem:[%s2996_s3 + $0x1e8] sm:$0xff]  ;;  %v1819_v53 = vpack.c.bf16 %v843_v45, %v842_v44  ;;  %v1865_v45 = vpack.c.bf16 %v915_v33, %v914_v32  ;;  %v922_v32 = vld [vmem:[%s2996_s3 + $0x3d0] sm:$0xff] }
 0x167   :  { %v1821_v56 = vpack.c.bf16 %v861_v51, %v860_v49  ;;  %v1835_v49 = vpack.c.bf16 %v867_v41, %v866_v40  ;;  %v923_v33 = vld [vmem:[%s2996_s3 + $0x3d8] sm:$0xff]  ;;  %v906_v40 = vld [vmem:[%s2996_s3 + $0x350] sm:$0xff] }
 0x168   :  { %v907_v41 = vld [vmem:[%s2996_s3 + $0x358] sm:$0xff] }
 0x169   :  { %1772 = vmatpush3.bf16.msra.mxu0 %v1771_v58  ;;  %1804 = vmatpush3.bf16.msra.mxu1 %v1803_v59  ;;  %v844_v58 = vld [vmem:[%s2996_s3 + $0x160] sm:$0xff]  ;;  %v845_v59 = vld [vmem:[%s2996_s3 + $0x168] sm:$0xff] }
 0x16a   :  { %1774 = vmatprep.subr.bf16.mxu0 %v1773_v62  ;;  %1806 = vmatprep.subr.bf16.mxu1 %v1805_v63  ;;  %v1823_v61 = vpack.c.bf16 %v845_v59, %v844_v58  ;;  %v830_v62 = vld [vmem:[%s2996_s3 + $0xf0] sm:$0xff]  ;;  %v831_v63 = vld [vmem:[%s2996_s3 + $0xf8] sm:$0xff] }
 0x16b   :  { %v1793_v1 = vpack.c.bf16 %v831_v63, %v830_v62  ;;  %v886_v58 = vld [vmem:[%s2996_s3 + $0x2b0] sm:$0xff]  ;;  %v919_v63 = vld [vmem:[%s2996_s3 + $0x3b8] sm:$0xff] }
 0x16c   :  { %v918_v62 = vld [vmem:[%s2996_s3 + $0x3b0] sm:$0xff] }
 0x16d   :  { %1776 = vmatpush3.bf16.msra.mxu0 %v1775_v6  ;;  %1808 = vmatpush3.bf16.msra.mxu1 %v1807_v7  ;;  %v1795_v6 = vpack.c.bf16 %v815_v4, %v814_v3  ;;  %v846_v7 = vld [vmem:[%s2996_s3 + $0x170] sm:$0xff] }
 0x16e   :  { %1778 = vmatprep.subr.bf16.mxu0 %v1777_v12  ;;  %1810 = vmatprep.subr.bf16.mxu1 %v1809_v13  ;;  %v1827_v9 = vpack.c.bf16 %v847_v8, %v846_v7  ;;  %v880_v12 = vld [vmem:[%s2996_s3 + $0x280] sm:$0xff]  ;;  %v881_v13 = vld [vmem:[%s2996_s3 + $0x288] sm:$0xff]  ;;  %v871_v7 = vld [vmem:[%s2996_s3 + $0x238] sm:$0xff] }
 0x16f   :  { %v1829_v15 = vpack.c.bf16 %v881_v13, %v880_v12  ;;  %v888_v12 = vld [vmem:[%s2996_s3 + $0x2c0] sm:$0xff]  ;;  %v889_v13 = vld [vmem:[%s2996_s3 + $0x2c8] sm:$0xff] }
 0x171   :  { %1780 = vmatpush3.bf16.msra.mxu0 %v1779_v22  ;;  %1812 = vmatpush3.bf16.msra.mxu1 %v1811_v23  ;;  %v896_v22 = vld [vmem:[%s2996_s3 + $0x300] sm:$0xff]  ;;  %v897_v23 = vld [vmem:[%s2996_s3 + $0x308] sm:$0xff] }
 0x172   :  { %1782 = vmatprep.subr.bf16.mxu0 %v1781_v30  ;;  %1814 = vmatprep.subr.bf16.mxu1 %v1813_v31  ;;  %v883_v31 = vld [vmem:[%s2996_s3 + $0x298] sm:$0xff] }
 0x173   :  { %v1833_v44 = vpack.c.bf16 %v883_v31, %v882_v24  ;;  %v904_v24 = vld [vmem:[%s2996_s3 + $0x340] sm:$0xff]  ;;  %v891_v31 = vld [vmem:[%s2996_s3 + $0x2d8] sm:$0xff] }
 0x175   :  { %1784 = vmatpush3.bf16.msra.mxu0 %v1783_v38  ;;  %1816 = vmatpush3.bf16.msra.mxu1 %v1815_v39  ;;  %v1831_v38 = vpack.c.bf16 %v865_v20, %v864_v19  ;;  %v1863_v39 = vpack.c.bf16 %v897_v23, %v896_v22  ;;  %v872_v19 = vld [vmem:[%s2996_s3 + $0x240] sm:$0xff]  ;;  %v873_v20 = vld [vmem:[%s2996_s3 + $0x248] sm:$0xff]  ;;  %v1845_v22 = vpack.c.bf16 %v889_v13, %v888_v12 }
 0x176   :  { %1786 = vmatprep.subr.bf16.mxu0 %v1785_v42  ;;  %1818 = vmatprep.subr.bf16.mxu1 %v1817_v43 }
 0x179   :  { %1788 = vmatpush3.bf16.msra.mxu0 %v1787_v52  ;;  %1820 = vmatpush3.bf16.msra.mxu1 %v1819_v53  ;;  %v868_v52 = vld [vmem:[%s2996_s3 + $0x220] sm:$0xff]  ;;  %v869_v53 = vld [vmem:[%s2996_s3 + $0x228] sm:$0xff] }
 0x17a   :  { %1790 = vmatprep.subr.bf16.mxu0 %v1789_v55  ;;  %1822 = vmatprep.subr.bf16.mxu1 %v1821_v56  ;;  %v900_v56 = vld [vmem:[%s2996_s3 + $0x320] sm:$0xff]  ;;  %v1839_v2 = vpack.c.bf16 %v869_v53, %v868_v52  ;;  %v894_v52 = vld [vmem:[%s2996_s3 + $0x2f0] sm:$0xff]  ;;  %v895_v53 = vld [vmem:[%s2996_s3 + $0x2f8] sm:$0xff] }
 0x17d   :  { %1792 = vmatpush3.bf16.msra.mxu0 %v1791_v60  ;;  %1824 = vmatpush3.bf16.msra.mxu1 %v1823_v61  ;;  %v887_v61 = vld [vmem:[%s2996_s3 + $0x2b8] sm:$0xff] }
 0x17e   :  { %1794 = vmatprep.subr.bf16.mxu0 %v1793_v1  ;;  %1826 = vmatprep.subr.bf16.mxu1 %v1825_v5  ;;  %v1871_v5 = vpack.c.bf16 %v901_v57, %v900_v56  ;;  %v1841_v8 = vpack.c.bf16 %v887_v61, %v886_v58  ;;  %v878_v58 = vld [vmem:[%s2996_s3 + $0x270] sm:$0xff]  ;;  %v1857_v61 = vpack.c.bf16 %v895_v53, %v894_v52 }
 0x181   :  { %1796 = vmatpush3.bf16.msra.mxu0 %v1795_v6  ;;  %1828 = vmatpush3.bf16.msra.mxu1 %v1827_v9  ;;  %v870_v6 = vld [vmem:[%s2996_s3 + $0x230] sm:$0xff]  ;;  %v1873_v9 = vpack.c.bf16 %v919_v63, %v918_v62  ;;  %v879_v63 = vld [vmem:[%s2996_s3 + $0x278] sm:$0xff] }
 0x182   :  { %1830 = vmatprep.subr.bf16.mxu0 %v1829_v15  ;;  %1862 = vmatprep.subr.bf16.mxu1 %v1861_v18  ;;  %v921_v15 = vld [vmem:[%s2996_s3 + $0x3c8] sm:$0xff]  ;;  %v1843_v16 = vpack.c.bf16 %v871_v7, %v870_v6 }
 0x183   :  { %v1877_v23 = vpack.c.bf16 %v921_v15, %v920_v14 }
 0x22f   :  { %v574_v29 = vpop.f32.mrb[4].mxu0  ;;  %v645_v30 = vpop.f32.mrb[4].mxu1 }
 0x230   :  { %v576_v34 = vpop.f32.mrb[5].mxu0  ;;  %v647_v35 = vpop.f32.mrb[5].mxu1  ;;  %v792_v42 = vmul.f32 %v574_v29, %v2293_v48  ;;  %v794_v43 = vmul.f32 %v645_v30, %v2295_v50  ;;  %v885_v48 = vld [vmem:[%s2996_s3 + $0x2a8] sm:$0xff]  ;;  %v916_v50 = vld [vmem:[%s2996_s3 + $0x3a0] sm:$0xff]  ;;  %v890_v30 = vld [vmem:[%s2996_s3 + $0x2d0] sm:$0xff] }
 0x231   :  { %v793_v36 = vmul.f32 %v576_v34, %v2227_v17  ;;  %v795_v37 = vmul.f32 %v647_v35, %v2236_v21  ;;  %v898_v17 = vld [vmem:[%s2996_s3 + $0x310] sm:$0xff]  ;;  %v899_v21 = vld [vmem:[%s2996_s3 + $0x318] sm:$0xff]  ;;  %v1837_v54 = vpack.c.bf16 %v885_v48, %v884_v46  ;;  %v1869_v55 = vpack.c.bf16 %v917_v47, %v916_v50  ;;  %v905_v29 = vld [vmem:[%s2996_s3 + $0x348] sm:$0xff] }
 0x232   :  { %v1867_v51 = vpack.c.bf16 %v899_v21, %v898_v17  ;;  %v1847_v34 = vpack.c.bf16 %v873_v20, %v872_v19  ;;  %v1879_v35 = vpack.c.bf16 %v905_v29, %v904_v24  ;;  %v1883_v21 = vpack.c.bf16 %v907_v41, %v906_v40  ;;  %v876_v46 = vld [vmem:[%s2996_s3 + $0x260] sm:$0xff]  ;;  %v877_v48 = vld [vmem:[%s2996_s3 + $0x268] sm:$0xff] }
 0x233   :  { %992 = vmatprep.mubr.f32.mxu0 %v793_v36  ;;  %1062 = vmatprep.mubr.f32.mxu1 %v795_v37  ;;  %v874_v36 = vld [vmem:[%s2996_s3 + $0x250] sm:$0xff]  ;;  %v875_v37 = vld [vmem:[%s2996_s3 + $0x258] sm:$0xff]  ;;  %v1855_v56 = vpack.c.bf16 %v877_v48, %v876_v46 }
 0x234   :  { %993 = vmatmul.mubr.f32.vlgmr.msra.gmra.mrb[8].mxu0 %v792_v42  ;;  %1063 = vmatmul.mubr.f32.vlgmr.msra.gmra.mrb[8].mxu1 %v794_v43  ;;  %v892_v42 = vld [vmem:[%s2996_s3 + $0x2e0] sm:$0xff]  ;;  %v893_v43 = vld [vmem:[%s2996_s3 + $0x2e8] sm:$0xff]  ;;  %v1851_v17 = vpack.c.bf16 %v875_v37, %v874_v36 }
 0x235   :  { %1832 = vmatpush3.bf16.msra.mxu0 %v1831_v38  ;;  %1864 = vmatpush3.bf16.msra.mxu1 %v1863_v39  ;;  %v1849_v38 = vpack.c.bf16 %v891_v31, %v890_v30  ;;  %v1881_v39 = vpack.c.bf16 %v923_v33, %v922_v32  ;;  %v1853_v50 = vpack.c.bf16 %v893_v43, %v892_v42 }
 0x236   :  { %1834 = vmatprep.subr.bf16.mxu0 %v1833_v44  ;;  %1866 = vmatprep.subr.bf16.mxu1 %v1865_v45  ;;  %v924_v44 = vld [vmem:[%s2996_s3 + $0x3e0] sm:$0xff]  ;;  %v925_v45 = vld [vmem:[%s2996_s3 + $0x3e8] sm:$0xff] }
 0x237   :  { %v2851_v59 = vpop.f32.mrb[6].mxu0  ;;  %v2853_v60 = vpop.f32.mrb[6].mxu1  ;;  %v1885_v47 = vpack.c.bf16 %v925_v45, %v924_v44 }
 0x238   :  { %v718_v0 = vpop.f32.mrb[7].mxu0  ;;  %v789_v1 = vpop.f32.mrb[7].mxu1  ;;  %v796_v7 = vmul.f32 %v2851_v59, %v2461_v10 }
 0x239   :  { %v797_v3 = vmul.f32 %v718_v0, %v2371_v25  ;;  %v799_v4 = vmul.f32 %v789_v1, %v2373_v26  ;;  %1836 = vmatpush3.bf16.msra.mxu0 %v1835_v49  ;;  %1868 = vmatpush3.bf16.msra.mxu1 %v1867_v51  ;;  %v902_v25 = vld [vmem:[%s2996_s3 + $0x330] sm:$0xff]  ;;  %v903_v26 = vld [vmem:[%s2996_s3 + $0x338] sm:$0xff]  ;;  %v908_v49 = vld [vmem:[%s2996_s3 + $0x360] sm:$0xff] }
 0x23a   :  { %1838 = vmatprep.subr.bf16.mxu0 %v1837_v54  ;;  %1870 = vmatprep.subr.bf16.mxu1 %v1869_v55  ;;  %v1875_v18 = vpack.c.bf16 %v903_v26, %v902_v25  ;;  %v909_v51 = vld [vmem:[%s2996_s3 + $0x368] sm:$0xff]  ;;  %v926_v54 = vld [vmem:[%s2996_s3 + $0x3f0] sm:$0xff]  ;;  %v927_v55 = vld [vmem:[%s2996_s3 + $0x3f8] sm:$0xff] }
 0x23b   :  { %1132 = vmatprep.mubr.f32.mxu0 %v797_v3  ;;  %1202 = vmatprep.mubr.f32.mxu1 %v799_v4  ;;  %v1887_v57 = vpack.c.bf16 %v909_v51, %v908_v49  ;;  %v1889_v62 = vpack.c.bf16 %v927_v55, %v926_v54  ;;  %v910_v0 = vld [vmem:[%s2996_s3 + $0x370] sm:$0xff]  ;;  %v911_v1 = vld [vmem:[%s2996_s3 + $0x378] sm:$0xff]  ;;  %v1208_v4 = vld [vmem:[#allocation6] sm:$0xff]  ;;  %s1992_s3 = smov [#allocation8]  }
 0x23c   :  { %v1891_v3 = vpack.c.bf16 %v911_v1, %v910_v0  ;;  %v1210_v25 = vld [vmem:[#allocation6 + $0x10] sm:$0xff]  ;;  %v1211_v26 = vld [vmem:[#allocation6 + $0x18] sm:$0xff]  ;;  %s1294_s23 = sshll.u32 %s1992_s3, 4  ;;  %s1295_s23 = int_to_ptr.vmem [resolvable:$true] %s1294_s23 }
 0x23d   :  { %1840 = vmatpush3.bf16.msra.mxu0 %v1839_v2  ;;  %1872 = vmatpush3.bf16.msra.mxu1 %v1871_v5  ;;  %v1859_v2 = vpack.c.bf16 %v879_v63, %v878_v58  ;;  %v1209_v5 = vld [vmem:[#allocation6 + $0x8] sm:$0xff]  ;;  %v1897_v12 = vpack.c.bf16 %v1211_v26, %v1210_v25  ;;  %s1957_s25 = scalar_lea.vmem %s1295_s23, 128  ;;  %p1962_p3 = scmp.lt.s32.totalorder %s1295_s23, %s1295_s23 }
 0x23e   :  { %1842 = vmatprep.subr.bf16.mxu0 %v1841_v8  ;;  %1874 = vmatprep.subr.bf16.mxu1 %v1873_v9  ;;  %v1894_v6 = vpack.c.bf16 %v1209_v5, %v1208_v4  ;;  %v798_v8 = vmul.f32 %v2853_v60, %v2463_v11  ;;  %v1990_v9 = vmov 0.0|0.0   ;;  %p1958_p2 = scmp.ne.s32.totalorder %s1295_s23, %s1957_s25  ;;  %p1963_p4 = scmp.lt.s32.totalorder %s1957_s25, %s1957_s25 }
 0x240   :  { %p1964_p5 = por %p1963_p4, %p1962_p3 }
 0x241   :  { %1844 = vmatpush3.bf16.msra.mxu0 %v1843_v16  ;;  %1876 = vmatpush3.bf16.msra.mxu1 %v1875_v18 }
 0x242   :  { %1846 = vmatprep.subr.bf16.mxu0 %v1845_v22  ;;  %1878 = vmatprep.subr.bf16.mxu1 %v1877_v23  ;;  %p1965_p6 = pnand %p1964_p5, %p1958_p2 }
 0x245   :  { %1848 = vmatpush3.bf16.msra.mxu0 %v1847_v34  ;;  %1880 = vmatpush3.bf16.msra.mxu1 %v1879_v35 }
 0x246   :  { %1850 = vmatprep.subr.bf16.mxu0 %v1849_v38  ;;  %1882 = vmatprep.subr.bf16.mxu1 %v1881_v39 }
 0x249   :  { %1852 = vmatpush3.bf16.msra.mxu0 %v1851_v17  ;;  %1884 = vmatpush3.bf16.msra.mxu1 %v1883_v21 }
 0x24a   :  { %1854 = vmatprep.subr.bf16.mxu0 %v1853_v50  ;;  %1886 = vmatprep.subr.bf16.mxu1 %v1885_v47 }
 0x24d   :  { %1856 = vmatpush3.bf16.msra.mxu0 %v1855_v56  ;;  %1888 = vmatpush3.bf16.msra.mxu1 %v1887_v57 }
 0x24e   :  { %1858 = vmatprep.subr.bf16.mxu0 %v1857_v61  ;;  %1890 = vmatprep.subr.bf16.mxu1 %v1889_v62 }
 0x251   :  { %1860 = vmatpush3.bf16.msra.mxu0 %v1859_v2  ;;  %1892 = vmatpush3.bf16.msra.mxu1 %v1891_v3 }
 0x252   :  { %1893 = vmatprep.subr.bf16.mxu0 %v1990_v9 }
 0x254   :  { %1133 = vmatmul.mubr.f32.vlgmr.msra.gmra.mrb[10].mxu0 %v796_v7  ;;  %1203 = vmatmul.mubr.f32.vlgmr.msra.gmra.mrb[10].mxu1 %v798_v8 }
 0x255   :  { %1895 = vmatpush3.bf16.msra.mxu0 %v1894_v6  ;;  %1602 = vmatprep.mubr.msk.f32.mxu0 %vm1991_vm1, %v1989_v28 }
 0x256   :  { %1896 = vmatprep.subr.bf16.mxu0 %v1990_v9 }
 0x259   :  { %1898 = vmatpush3.bf16.msra.mxu0 %v1897_v12 }
 0x25c   :  { %1603 = vmatmul.mubr.msk.f32.vlgmr.msra.gmra.mrb[12].mxu0 %vm504_vm0, %v2571_v27 }
 0x307   :  { %v1481_v10 = vpop.f32.mrb[8].mxu0  ;;  %v1516_v59 = vpop.f32.mrb[8].mxu1 }
 0x308   :  { %v1482_v13 = vpop.f32.mrb[9].mxu0  ;;  %v1517_v11 = vpop.f32.mrb[9].mxu1 }
 0x309   :  { %v1483_v60 = vadd.f32 %v1482_v13, %v1481_v10  ;;  %v1518_v14 = vadd.f32 %v1517_v11, %v1516_v59 }
 0x30b   :  { %v1065_v15 = vadd.f32 %v1518_v14, %v1483_v60 }
 0x327   :  { %v1551_v16 = vpop.f32.mrb[10].mxu0  ;;  %v1586_v18 = vpop.f32.mrb[10].mxu1 }
 0x328   :  { %v1552_v19 = vpop.f32.mrb[11].mxu0  ;;  %v1587_v20 = vpop.f32.mrb[11].mxu1 }
 0x329   :  { %v1553_v22 = vadd.f32 %v1552_v19, %v1551_v16  ;;  %v1588_v23 = vadd.f32 %v1587_v20, %v1586_v18 }
 0x32b   :  { %v1135_v24 = vadd.f32 %v1553_v22, %v1065_v15 }
 0x32d   :  { %v1205_v28 = vadd.f32 %v1588_v23, %v1135_v24 }
 0x32f   :  { %v1278_v29 = vpop.f32.mrb[12].mxu0 }
 0x330   :  { %1911 = vrcp.f32 %v1278_v29  ;;  %v1604_v30 = vpop.f32.mrb[13].mxu0 }
 0x33a   :  { %v1912_v31 = vpop.eup %1911 }
 0x33b   :  { %v1283_v27 = vmul.f32 %v1912_v31, %v1278_v29 }
 0x33d   :  { %v1284_v32 = vsub.f32 2.0, %v1283_v27 }
 0x33f   :  { %v1285_v33 = vmul.f32 %v1912_v31, %v1284_v32 }
 0x341   :  { %v1286_v34 = vmul.f32 %v1285_v33, %v1205_v28 }
 0x343   :  { %1287 = vst [vmem:[#allocation8] sm:$0xff] %v1286_v34 }
 0x344   :  { %1968 = shalt.err (!%p1965_p6)
}
 0x345   :  { %s1969_s28 = scalar_lea.hbm %s2999_s6, 128 }
 0x346   :  { %p1970_p7 = scmp.ne.s32.totalorder %s2999_s6, %s1969_s28  ;;  %p1973_p8 = scmp.lt.u32.totalorder %s1969_s28, %s2999_s6 }
 0x348   :  { %p1975_p9 = pnand %p1973_p8, %p1970_p7 }
 0x34a   :  { %1978 = shalt.err (!%p1975_p9)
}
 0x34b   :  { %1297 = dma.vmem_to_hbm [thread:$0]  %s1295_s23, 128, %s2999_s6, [#allocation5]  }
 0x34c   :  { %1983 = dma.done.wait [#allocation5], 128  }
 0x34d   :  { %1984 = vsyncadd [#allocation5], 4294967168 }
 0x34e   :  { %1301 = vsyncpa [#allocation4], 1 }
 0x34f   :  { %1302 = vsyncpa [#allocation7], 1 }
 0x350   :  { %1303 = vsyncpa [#allocation5], 1 }

</bundles_post_ra>
